<compile_context>
chip_gen: v7x
topology: tpu7x:2x2x1
jax: 0.10.0
libtpu: 0.0.40
codegen_flags: <defaults>
</compile_context>

<pallas_src>
import math

import jax
import jax.numpy as jnp
from jax import lax
from jax.experimental import pallas as pl
from jax.experimental.pallas import tpu as pltpu

LN_EPS = 1e-5  # torch.nn.LayerNorm default


def _round_up(n, m):
    return ((n + m - 1) // m) * m


# ---------------------------------------------------------------------------
# Kernels
# ---------------------------------------------------------------------------

def _packed_kernel(x_ref, w_ref, b_ref, g_ref, be_ref, m_ref, o_ref):
    """Lane-dense path: P consecutive rows packed per 128-lane group.

    x_ref:  (TR, P*T)    packed input rows (input dtype)
    w_ref:  (P*T, P*D)   bf16 block-diagonal *pre-centered* weight  kron(I_P, W_c)
    b_ref:  (1, P*D)     f32 pre-centered conv bias tiled P times
    g_ref:  (1, P*D)     f32 LayerNorm weight tiled P times
    be_ref: (1, P*D)     f32 LayerNorm bias tiled P times
    m_ref:  (P*D, P*D)   bf16 segment-averaging matrix  kron(I_P, ones(D,D)/D)
    o_ref:  (TR, P*D)
    """
    centered = jnp.dot(x_ref[...].astype(jnp.bfloat16), w_ref[...],
                       preferred_element_type=jnp.float32) + b_ref[...]
    # Per-D-segment variance via one lane-dense matmul (no cross-lane relayout).
    sq = (centered * centered).astype(jnp.bfloat16)
    var = jnp.dot(sq, m_ref[...], preferred_element_type=jnp.float32)
    scale = g_ref[...] * lax.rsqrt(var + LN_EPS)   # gamma folded into rsqrt scale
    o_ref[...] = (centered * scale + be_ref[...]).astype(o_ref.dtype)


def _rowwise_kernel(x_ref, w_ref, b_ref, g_ref, be_ref, o_ref):
    """Fallback path (D >= 128 or 128 % D != 0): one logical row per sublane row."""
    centered = jnp.dot(x_ref[...].astype(jnp.bfloat16), w_ref[...],
                       preferred_element_type=jnp.float32) + b_ref[...]
    var = jnp.mean(centered * centered, axis=-1, keepdims=True)
    scale = g_ref[...] * lax.rsqrt(var + LN_EPS)
    o_ref[...] = (centered * scale + be_ref[...]).astype(o_ref.dtype)


# ---------------------------------------------------------------------------
# Wrapper
# ---------------------------------------------------------------------------

_TILE_VMEM_BUDGET = 16 * 1024 * 1024     # bytes for per-tile buffers (dbuf in/out + intermediates)
_MAX_TILE_ROWS = 4096                    # cap on (packed) rows per grid step
_VMEM_LIMIT_BYTES = 32 * 1024 * 1024     # explicit scoped-VMEM limit (safe on v5e/v6e/v7x)
_NUM_INTERMEDIATES = 5                   # f32 temporaries of output width kept in VMEM


def _choose_tile_rows(total_rows, in_lanes, out_lanes, in_bytes, out_bytes):
    """Pick rows-per-tile from 128-lane-padded VMEM footprint (honest accounting)."""
    lane_pad = lambda n: _round_up(n, 128)
    per_row = 2 * lane_pad(in_lanes) * in_bytes            # input tile, double-buffered
    per_row += 2 * lane_pad(out_lanes) * out_bytes         # output tile, double-buffered
    per_row += _NUM_INTERMEDIATES * lane_pad(out_lanes) * 4  # f32 intermediates
    tr = _TILE_VMEM_BUDGET // per_row
    tr = max(8, min(_MAX_TILE_ROWS, tr))
    tr = (tr // 8) * 8
    return min(tr, _round_up(total_rows, 8))


def _split_for_megacore(total_rows, tile_rows):
    """Ensure >= 2 grid tiles when possible so v7x's two TensorCores both get work."""
    num_tiles = pl.cdiv(total_rows, tile_rows)
    if num_tiles == 1 and total_rows >= 16:
        tile_rows = _round_up(pl.cdiv(total_rows, 2), 8)
        num_tiles = pl.cdiv(total_rows, tile_rows)
    return tile_rows, num_tiles


def time_embedding(x, conv_weight, conv_bias, ln_weight, ln_bias, out_dtype=None):
    """x: (B, L, time_num) -> (B, L, model_dim), matching TimeEmbedding.forward."""
    B, L, T = x.shape
    D = conv_weight.shape[0]          # conv_weight: (model_dim, time_num)
    R = B * L
    out_dtype = x.dtype if out_dtype is None else out_dtype

    # Fold LayerNorm mean-centering into the projection (exact two-pass LN math):
    #   centered = x @ (W^T (I - 11^T/D)) + (b - mean(b))
    w_t = conv_weight.astype(jnp.float32).T                                   # (T, D)
    center = jnp.eye(D, dtype=jnp.float32) - jnp.full((D, D), 1.0 / D, jnp.float32)
    w_c = w_t @ center                                                        # (T, D)
    b_c = conv_bias.astype(jnp.float32)
    b_c = b_c - jnp.mean(b_c)
    g_f = ln_weight.astype(jnp.float32)
    be_f = ln_bias.astype(jnp.float32)

    # Lane packing factor: pack P consecutive rows per 128-lane group when possible.
    P = 128 // D if (D < 128 and 128 % D == 0) else 1
    row_align = 8 * P

    # Pad only to the packing alignment (<= row_align-1 wasted rows), not to a full tile.
    R_pad = _round_up(R, row_align)
    x2d = x.reshape(R, T)
    if R_pad != R:
        x2d = jnp.pad(x2d, ((0, R_pad - R), (0, 0)))

    in_bytes = x2d.dtype.itemsize
    out_bytes = jnp.dtype(out_dtype).itemsize
    cparams = pltpu.CompilerParams(dimension_semantics=("parallel",),
                                   vmem_limit_bytes=_VMEM_LIMIT_BYTES)

    if P > 1:
        # Pack rows: (R_pad, T) -> (R_pad/P, P*T); result comes back as (R_pad/P, P*D).
        Rp = R_pad // P
        xp = x2d.reshape(Rp, P * T)

        eye_p = jnp.eye(P, dtype=jnp.float32)
        w_blk = jnp.kron(eye_p, w_c).astype(jnp.bfloat16)                     # (P*T, P*D)
        m_seg = jnp.kron(eye_p, jnp.full((D, D), 1.0 / D, jnp.float32)
                         ).astype(jnp.bfloat16)                              # (P*D, P*D)
        b_p = jnp.tile(b_c, P).reshape(1, P * D)
        g_p = jnp.tile(g_f, P).reshape(1, P * D)
        be_p = jnp.tile(be_f, P).reshape(1, P * D)

        TR = _choose_tile_rows(Rp, P * T, P * D, in_bytes, out_bytes)
        TR, num_tiles = _split_for_megacore(Rp, TR)

        out = pl.pallas_call(
            _packed_kernel,
            out_shape=jax.ShapeDtypeStruct((Rp, P * D), out_dtype),
            grid_spec=pltpu.PrefetchScalarGridSpec(
                num_scalar_prefetch=0,
                grid=(num_tiles,),
                in_specs=[
                    pl.BlockSpec((TR, P * T), lambda i: (i, 0)),
                    pl.BlockSpec((P * T, P * D), lambda i: (0, 0)),
                    pl.BlockSpec((1, P * D), lambda i: (0, 0)),
                    pl.BlockSpec((1, P * D), lambda i: (0, 0)),
                    pl.BlockSpec((1, P * D), lambda i: (0, 0)),
                    pl.BlockSpec((P * D, P * D), lambda i: (0, 0)),
                ],
                out_specs=pl.BlockSpec((TR, P * D), lambda i: (i, 0)),
            ),
            compiler_params=cparams,
        )(xp, w_blk, b_p, g_p, be_p, m_seg)
        out = out.reshape(R_pad, D)
    else:
        w_bf = w_c.astype(jnp.bfloat16)
        b2d = b_c.reshape(1, D)
        g2d = g_f.reshape(1, D)
        be2d = be_f.reshape(1, D)

        TR = _choose_tile_rows(R_pad, T, D, in_bytes, out_bytes)
        TR, num_tiles = _split_for_megacore(R_pad, TR)

        out = pl.pallas_call(
            _rowwise_kernel,
            out_shape=jax.ShapeDtypeStruct((R_pad, D), out_dtype),
            grid_spec=pltpu.PrefetchScalarGridSpec(
                num_scalar_prefetch=0,
                grid=(num_tiles,),
                in_specs=[
                    pl.BlockSpec((TR, T), lambda i: (i, 0)),
                    pl.BlockSpec((T, D), lambda i: (0, 0)),
                    pl.BlockSpec((1, D), lambda i: (0, 0)),
                    pl.BlockSpec((1, D), lambda i: (0, 0)),
                    pl.BlockSpec((1, D), lambda i: (0, 0)),
                ],
                out_specs=pl.BlockSpec((TR, D), lambda i: (i, 0)),
            ),
            compiler_params=cparams,
        )(x2d, w_bf, b2d, g2d, be2d)

    return out[:R].reshape(B, L, D)


# ---------------------------------------------------------------------------
# Params / reference
# ---------------------------------------------------------------------------

def init_params(key, model_dim, time_num):
    """Deterministic parameter init mirroring the PyTorch module's shapes/init."""
    k_w, k_b = jax.random.split(key)

    # nn.Conv1d(time_num, model_dim, 1).weight: (model_dim, time_num, 1)
    # kaiming_normal_(mode='fan_in', nonlinearity='leaky_relu'):
    #   gain = sqrt(2 / (1 + 0.01**2)), std = gain / sqrt(fan_in), fan_in = time_num
    gain = math.sqrt(2.0 / (1.0 + 0.01 ** 2))
    std = gain / math.sqrt(time_num)
    conv_weight = std * jax.random.normal(k_w, (model_dim, time_num), jnp.float32)

    # Conv1d bias default: U(-1/sqrt(fan_in), 1/sqrt(fan_in))
    bound = 1.0 / math.sqrt(time_num)
    conv_bias = jax.random.uniform(
        k_b, (model_dim,), jnp.float32, minval=-bound, maxval=bound)

    # LayerNorm(model_dim): weight=1, bias=0
    ln_weight = jnp.ones((model_dim,), jnp.float32)
    ln_bias = jnp.zeros((model_dim,), jnp.float32)
    return conv_weight, conv_bias, ln_weight, ln_bias


def reference(x, conv_weight, conv_bias, ln_weight, ln_bias):
    y = jnp.einsum("blt,dt->bld", x, conv_weight) + conv_bias
    mean = jnp.mean(y, axis=-1, keepdims=True)
    var = jnp.mean((y - mean) ** 2, axis=-1, keepdims=True)
    return (y - mean) / jnp.sqrt(var + LN_EPS) * ln_weight + ln_bias


if __name__ == "__main__":
    model_dim = 32
    time_num = 4
    B, L = 2, 8

    key = jax.random.PRNGKey(0)
    k_x, k_p = jax.random.split(key)
    x = jax.random.normal(k_x, (B, L, time_num), jnp.float32)
    params = init_params(k_p, model_dim, time_num)

    out = time_embedding(x, *params)
    out = jax.block_until_ready(out)

    ref = reference(x, *params)
    assert out.shape == (B, L, model_dim)
    # bf16 MXU operands (f32 accumulation + f32 LayerNorm math) => relaxed tolerance.
    assert jnp.allclose(out, ref, atol=5e-2, rtol=5e-2), "mismatch vs JAX reference"

    print("KERNEL_OK")
</pallas_src>

<mosaic_0001>
module attributes {stable_mosaic.version = 11 : i64} {
  func.func @_packed_kernel(%arg0: i32, %arg1: memref<8x16xf32, #tpu.memory_space<vmem>>, %arg2: memref<16x128xbf16, #tpu.memory_space<vmem>>, %arg3: memref<1x128xf32, #tpu.memory_space<vmem>>, %arg4: memref<1x128xf32, #tpu.memory_space<vmem>>, %arg5: memref<1x128xf32, #tpu.memory_space<vmem>>, %arg6: memref<128x128xbf16, #tpu.memory_space<vmem>>, %arg7: memref<8x128xf32, #tpu.memory_space<vmem>>) attributes {dimension_semantics = [#tpu.dimension_semantics<parallel>], iteration_bounds = array<i64: 1>, scalar_prefetch = 0 : i64, scratch_operands = 0 : i64, tpu.core_type = #tpu.core_type<tc>, window_params = [{transform_indices = @transform_0, window_bounds = array<i64: 8, 16>}, {pipeline_mode = #tpu.pipeline_mode<synchronous>, transform_indices = @transform_1, window_bounds = array<i64: 16, 128>}, {pipeline_mode = #tpu.pipeline_mode<synchronous>, transform_indices = @transform_2, window_bounds = array<i64: 1, 128>}, {pipeline_mode = #tpu.pipeline_mode<synchronous>, transform_indices = @transform_3, window_bounds = array<i64: 1, 128>}, {pipeline_mode = #tpu.pipeline_mode<synchronous>, transform_indices = @transform_4, window_bounds = array<i64: 1, 128>}, {pipeline_mode = #tpu.pipeline_mode<synchronous>, transform_indices = @transform_5, window_bounds = array<i64: 128, 128>}, {transform_indices = @transform_6, window_bounds = array<i64: 8, 128>}]} {
    %c0 = arith.constant 0 : index
    %c0_0 = arith.constant 0 : index
    %0 = vector.load %arg1[%c0, %c0_0] : memref<8x16xf32, #tpu.memory_space<vmem>>, vector<8x16xf32>
    %1 = arith.truncf %0 : vector<8x16xf32> to vector<8x16xbf16>
    %c0_1 = arith.constant 0 : index
    %c0_2 = arith.constant 0 : index
    %2 = vector.load %arg2[%c0_1, %c0_2] : memref<16x128xbf16, #tpu.memory_space<vmem>>, vector<16x128xbf16>
    %cst = arith.constant dense<0.000000e+00> : vector<8x128xf32>
    %3 = tpu.matmul %1, %2, %cst {dimension_numbers = #tpu.dot_dimension_numbers<[1], [0], [0], [1], [0, 0, 1, 1], [], []>} : vector<8x16xbf16>, vector<16x128xbf16>, vector<8x128xf32> -> vector<8x128xf32>
    %c0_3 = arith.constant 0 : index
    %c0_4 = arith.constant 0 : index
    %4 = vector.load %arg3[%c0_3, %c0_4] : memref<1x128xf32, #tpu.memory_space<vmem>>, vector<1x128xf32>
    %5 = vector.broadcast %4 : vector<1x128xf32> to vector<8x128xf32>
    %6 = arith.addf %3, %5 : vector<8x128xf32>
    %7 = arith.mulf %6, %6 : vector<8x128xf32>
    %8 = arith.truncf %7 : vector<8x128xf32> to vector<8x128xbf16>
    %c0_5 = arith.constant 0 : index
    %c0_6 = arith.constant 0 : index
    %9 = vector.load %arg6[%c0_5, %c0_6] : memref<128x128xbf16, #tpu.memory_space<vmem>>, vector<128x128xbf16>
    %cst_7 = arith.constant dense<0.000000e+00> : vector<8x128xf32>
    %10 = tpu.matmul %8, %9, %cst_7 {dimension_numbers = #tpu.dot_dimension_numbers<[1], [0], [0], [1], [0, 0, 1, 1], [], []>} : vector<8x128xbf16>, vector<128x128xbf16>, vector<8x128xf32> -> vector<8x128xf32>
    %c0_8 = arith.constant 0 : index
    %c0_9 = arith.constant 0 : index
    %11 = vector.load %arg4[%c0_8, %c0_9] : memref<1x128xf32, #tpu.memory_space<vmem>>, vector<1x128xf32>
    %cst_10 = arith.constant 9.99999974E-6 : f32
    %12 = vector.broadcast %cst_10 : f32 to vector<8x128xf32>
    %13 = arith.addf %10, %12 : vector<8x128xf32>
    %14 = math.rsqrt %13 : vector<8x128xf32>
    %15 = vector.broadcast %11 : vector<1x128xf32> to vector<8x128xf32>
    %16 = arith.mulf %15, %14 : vector<8x128xf32>
    %17 = arith.mulf %6, %16 : vector<8x128xf32>
    %c0_11 = arith.constant 0 : index
    %c0_12 = arith.constant 0 : index
    %18 = vector.load %arg5[%c0_11, %c0_12] : memref<1x128xf32, #tpu.memory_space<vmem>>, vector<1x128xf32>
    %19 = vector.broadcast %18 : vector<1x128xf32> to vector<8x128xf32>
    %20 = arith.addf %17, %19 : vector<8x128xf32>
    %c0_13 = arith.constant 0 : index
    %c0_14 = arith.constant 0 : index
    %21 = vector.load %arg7[%c0_13, %c0_14] : memref<8x128xf32, #tpu.memory_space<vmem>>, vector<8x128xf32>
    tpu.vector_store %arg7[%c0_13, %c0_14], %20 {strides = array<i32>} : memref<8x128xf32, #tpu.memory_space<vmem>>, vector<8x128xf32>,
    return
  }
  func.func @transform_0(%arg0: i32) -> (i32, i32) {
    %c0_i32 = arith.constant 0 : i32
    %c0_i32_0 = arith.constant 0 : i32
    return %arg0, %c0_i32 : i32, i32
  }
  func.func @transform_1(%arg0: i32) -> (i32, i32) {
    %c0_i32 = arith.constant 0 : i32
    %c0_i32_0 = arith.constant 0 : i32
    %c0_i32_1 = arith.constant 0 : i32
    return %c0_i32, %c0_i32_0 : i32, i32
  }
  func.func @transform_2(%arg0: i32) -> (i32, i32) {
    %c0_i32 = arith.constant 0 : i32
    %c0_i32_0 = arith.constant 0 : i32
    %c0_i32_1 = arith.constant 0 : i32
    return %c0_i32, %c0_i32_0 : i32, i32
  }
  func.func @transform_3(%arg0: i32) -> (i32, i32) {
    %c0_i32 = arith.constant 0 : i32
    %c0_i32_0 = arith.constant 0 : i32
    %c0_i32_1 = arith.constant 0 : i32
    return %c0_i32, %c0_i32_0 : i32, i32
  }
  func.func @transform_4(%arg0: i32) -> (i32, i32) {
    %c0_i32 = arith.constant 0 : i32
    %c0_i32_0 = arith.constant 0 : i32
    %c0_i32_1 = arith.constant 0 : i32
    return %c0_i32, %c0_i32_0 : i32, i32
  }
  func.func @transform_5(%arg0: i32) -> (i32, i32) {
    %c0_i32 = arith.constant 0 : i32
    %c0_i32_0 = arith.constant 0 : i32
    %c0_i32_1 = arith.constant 0 : i32
    return %c0_i32, %c0_i32_0 : i32, i32
  }
  func.func @transform_6(%arg0: i32) -> (i32, i32) {
    %c0_i32 = arith.constant 0 : i32
    %c0_i32_0 = arith.constant 0 : i32
    return %arg0, %c0_i32 : i32, i32
  }
}

</mosaic_0001>

<bundles_post_ra>
// kernel: tpu_custom_call.1
= control target key start
LH: loop header
LB: loop body
LE: loop exit
PB: predicated region body
PF: predicated region fallthrough
CT: control target
= control target key end

     0   :  { %11 = vsyncpa [#allocation3], 0  ;;  %s535_s0 = inlined_call_operand.hbm [shape: f32[8,16], index: 0, kind: input, shape index: {}]   ;;  %s536_s1 = inlined_call_operand.hbm [shape: bf16[16,128], index: 1, kind: input, shape index: {}]   ;;  %s537_s2 = inlined_call_operand.vmem [shape: f32[1,128], index: 2, kind: input, shape index: {}]   ;;  %s538_s3 = inlined_call_operand.vmem [shape: f32[1,128], index: 3, kind: input, shape index: {}]   ;;  %s539_s4 = inlined_call_operand.vmem [shape: f32[1,128], index: 4, kind: input, shape index: {}]   ;;  %s540_s5 = inlined_call_operand.hbm [shape: bf16[128,128], index: 5, kind: input, shape index: {}]   ;;  %s541_s6 = inlined_call_operand.hbm [shape: f32[8,128], index: 6, kind: output, shape index: {}]  }
   0x1   :  { %12 = vsyncpa [#allocation6], 0 }
   0x2   :  { %13 = vsyncpa [#allocation4], 0  ;;  %s429_s21 = smov [#allocation5]   ;;  %s335_s25 = scalar_lea.hbm %s536_s1, 128 }
   0x3   :  { %s29_s22 = sshll.u32 %s429_s21, 4  ;;  %p336_p0 = scmp.ne.s32.totalorder %s536_s1, %s335_s25  ;;  %s30_s22 = int_to_ptr.vmem [resolvable:$true] %s29_s22 }
   0x4   :  { %p339_p1 = scmp.lt.u32.totalorder %s335_s25, %s536_s1 }
   0x6   :  { %p341_p2 = pnand %p339_p1, %p336_p0 }
   0x8   :  { %344 = shalt.err (!%p341_p2)
}
   0x9   :  { %s345_s30 = scalar_lea.vmem %s30_s22, 128  ;;  %p350_p4 = scmp.lt.s32.totalorder %s30_s22, %s30_s22 }
   0xa   :  { %p346_p3 = scmp.ne.s32.totalorder %s30_s22, %s345_s30  ;;  %p351_p5 = scmp.lt.s32.totalorder %s345_s30, %s345_s30 }
   0xc   :  { %p352_p6 = por %p351_p5, %p350_p4 }
   0xe   :  { %p353_p7 = pnand %p352_p6, %p346_p3 }
  0x10   :  { %356 = shalt.err (!%p353_p7)
}
  0x11   :  { %s430_s7 = smov 64   ;;  %s431_s8 = smov 4  }
  0x12   :  { %35 = dma.hbm_to_vmem [thread:$0]  %s536_s1, 128, %s30_s22, [#allocation6], %s430_s7, %s430_s7, %s431_s8  }
  0x13   :  { %s432_s11 = smov [#allocation2]   ;;  %s433_s13 = smov [#allocation7]  }
  0x14   :  { %s20_s12 = sshll.u32 %s432_s11, 4  ;;  %s47_s14 = sshll.u32 %s433_s13, 4  ;;  %s21_s12 = int_to_ptr.vmem [resolvable:$true] %s20_s12  ;;  %s48_s14 = int_to_ptr.vmem [resolvable:$true] %s47_s14 }
  0x15   :  { %s357_s17 = scalar_lea.hbm %s535_s0, 128 }
  0x16   :  { %p358_p8 = scmp.ne.s32.totalorder %s535_s0, %s357_s17  ;;  %p361_p9 = scmp.lt.u32.totalorder %s357_s17, %s535_s0 }
  0x18   :  { %p363_p10 = pnand %p361_p9, %p358_p8 }
  0x1a   :  { %366 = shalt.err (!%p363_p10)
}
  0x1b   :  { %s367_s1 = scalar_lea.vmem %s21_s12, 128  ;;  %p372_p12 = scmp.lt.s32.totalorder %s21_s12, %s21_s12 }
  0x1c   :  { %p368_p11 = scmp.ne.s32.totalorder %s21_s12, %s367_s1  ;;  %p373_p13 = scmp.lt.s32.totalorder %s367_s1, %s367_s1 }
  0x1e   :  { %p374_p0 = por %p373_p13, %p372_p12 }
  0x20   :  { %p375_p1 = pnand %p374_p0, %p368_p11 }
  0x22   :  { %378 = shalt.err (!%p375_p1)
}
  0x23   :  { %23 = dma.hbm_to_vmem [thread:$0]  %s535_s0, 128, %s21_s12, [#allocation3]  }
  0x24   :  { %s379_s26 = scalar_lea.hbm %s540_s5, 1024 }
  0x25   :  { %p380_p2 = scmp.ne.s32.totalorder %s540_s5, %s379_s26  ;;  %p383_p3 = scmp.lt.u32.totalorder %s379_s26, %s540_s5 }
  0x27   :  { %p385_p4 = pnand %p383_p3, %p380_p2 }
  0x29   :  { %388 = shalt.err (!%p385_p4)
}
  0x2a   :  { %s389_s9 = scalar_lea.vmem %s48_s14, 1024  ;;  %p394_p6 = scmp.lt.s32.totalorder %s48_s14, %s48_s14 }
  0x2b   :  { %p390_p5 = scmp.ne.s32.totalorder %s48_s14, %s389_s9  ;;  %p395_p7 = scmp.lt.s32.totalorder %s389_s9, %s389_s9 }
  0x2d   :  { %p396_p8 = por %p395_p7, %p394_p6 }
  0x2f   :  { %p397_p9 = pnand %p396_p8, %p390_p5 }
  0x31   :  { %400 = shalt.err (!%p397_p9)
}
  0x32   :  { %53 = dma.hbm_to_vmem [thread:$0]  %s540_s5, 1024, %s48_s14, [#allocation6], %s430_s7, %s430_s7, %s431_s8  }
  0x33   :  { %423 = dma.done.wait [#allocation3], 128  }
  0x34   :  { %424 = vsyncadd [#allocation3], 4294967168 }
  0x35   :  { %425 = dma.done.wait [#allocation6], 1152  }
  0x36   :  { %426 = vsyncadd [#allocation6], 4294966144  ;;  %v434_v0 = vmov 0.0   ;;  %vm435_vm0 = vmmov 0   ;;  %v324_v1 = vld [vmem:[#allocation5] sm:$0xff]   ;;  %v64_v2 = vld [vmem:[#allocation2] sm:$0xff] }
  0x37   :  { %290 = vmatprep.subr.bf16.mxu0 %v434_v0  ;;  %292 = vmatprep.mubr.msk.bf16.mxu0 %vm435_vm0, %v434_v0  ;;  %v65_v3 = vpack.c.bf16 %v64_v2, %v64_v2  ;;  %vm81_vm1 = vcmask 130048   ;;  %v325_v4 = vld [vmem:[#allocation7] sm:$0xff]   ;;  %v326_v5 = vld [vmem:[#allocation7 + $0x8] sm:$0xff]   ;;  %v327_v6 = vld [vmem:[#allocation7 + $0x10] sm:$0xff]   ;;  %s436_s13 = smov [#allocation8]  }
  0x38   :  { %296 = vmatprep.subr.bf16.mxu1 %v434_v0  ;;  %312 = vmatprep.mubr.msk.bf16.mxu1 %vm435_vm0, %v434_v0  ;;  %v328_v7 = vld [vmem:[#allocation7 + $0x18] sm:$0xff]   ;;  %v329_v8 = vld [vmem:[#allocation7 + $0x20] sm:$0xff]   ;;  %v330_v9 = vld [vmem:[#allocation7 + $0x28] sm:$0xff]   ;;  %s256_s14 = sshll.u32 %s436_s13, 4  ;;  %s257_s14 = int_to_ptr.vmem [resolvable:$true] %s256_s14 }
  0x39   :  { %291 = vmatpush3.bf16.msra.mxu0 %v324_v1  ;;  %297 = vmatpush3.bf16.msra.mxu1 %v325_v4  ;;  %v331_v10 = vld [vmem:[#allocation7 + $0x30] sm:$0xff]   ;;  %v332_v11 = vld [vmem:[#allocation7 + $0x38] sm:$0xff]   ;;  %s401_s15 = scalar_lea.vmem %s257_s14, 128  ;;  %p406_p11 = scmp.lt.s32.totalorder %s257_s14, %s257_s14 }
  0x3a   :  { %298 = vmatprep.subr.bf16.mxu1 %v434_v0  ;;  %v266_v12 = vld [vmem:[%s537_s2] ss:$0 sm:$0xff]  ;;  %p402_p10 = scmp.ne.s32.totalorder %s257_s14, %s401_s15  ;;  %p407_p12 = scmp.lt.s32.totalorder %s401_s15, %s401_s15 }
  0x3b   :  { %v277_v25 = vld [vmem:[%s538_s3] ss:$0 sm:$0xff] }
  0x3c   :  { %293 = vmatmul.mubr.msk.bf16.vlgmr.msra.gmra.mrb[0].mxu0 %vm81_vm1, %v65_v3  ;;  %v278_v28 = vld [vmem:[%s539_s4] ss:$0 sm:$0xff]  ;;  %p408_p13 = por %p407_p12, %p406_p11 }
  0x3d   :  { %299 = vmatpush3.bf16.msra.mxu1 %v326_v5 }
  0x3e   :  { %300 = vmatprep.subr.bf16.mxu1 %v434_v0  ;;  %p409_p0 = pnand %p408_p13, %p402_p10 }
  0x41   :  { %301 = vmatpush3.bf16.msra.mxu1 %v327_v6 }
  0x42   :  { %302 = vmatprep.subr.bf16.mxu1 %v434_v0 }
  0x45   :  { %303 = vmatpush3.bf16.msra.mxu1 %v328_v7 }
  0x46   :  { %304 = vmatprep.subr.bf16.mxu1 %v434_v0 }
  0x49   :  { %305 = vmatpush3.bf16.msra.mxu1 %v329_v8 }
  0x4a   :  { %306 = vmatprep.subr.bf16.mxu1 %v434_v0 }
  0x4d   :  { %307 = vmatpush3.bf16.msra.mxu1 %v330_v9 }
  0x4e   :  { %308 = vmatprep.subr.bf16.mxu1 %v434_v0 }
  0x51   :  { %309 = vmatpush3.bf16.msra.mxu1 %v331_v10 }
  0x52   :  { %310 = vmatprep.subr.bf16.mxu1 %v434_v0 }
  0x55   :  { %311 = vmatpush3.bf16.msra.mxu1 %v332_v11 }
 0x10f   :  { %v119_v13 = vpop.f32.mrb[0].mxu0 }
 0x110   :  { %v120_v14 = vadd.f32 %v266_v12, %v119_v13  ;;  %v294_v15 = vpop.f32.mrb[1].mxu0 }
 0x111   :  { %v122_v16 = vpop.f32.mrb[2].mxu0 }
 0x112   :  { %v125_v17 = vmul.f32 %v120_v14, %v120_v14  ;;  %v295_v18 = vpop.f32.mrb[3].mxu0 }
 0x114   :  { %v126_v19 = vpack.c.bf16 %v125_v17, %v125_v17 }
 0x116   :  { %313 = vmatmul.mubr.bf16.vlgmr.msra.gmra.mrb[0].mxu1 %v126_v19 }
 0x1e9   :  { %v226_v20 = vpop.f32.mrb[0].mxu1 }
 0x1ea   :  { %v227_v21 = vadd.f32 1e-05, %v226_v20  ;;  %v314_v22 = vpop.f32.mrb[1].mxu1 }
 0x1eb   :  { %v229_v23 = vpop.f32.mrb[2].mxu1 }
 0x1ec   :  { %333 = vrsqrt.f32 %v227_v21  ;;  %v315_v24 = vpop.f32.mrb[3].mxu1 }
 0x1f6   :  { %v334_v26 = vpop.eup %333 }
 0x1f7   :  { %v239_v27 = vmul.f32 %v334_v26, %v277_v25 }
 0x1f9   :  { %v240_v29 = vmul.f32 %v239_v27, %v120_v14 }
 0x1fb   :  { %v248_v30 = vadd.f32 %v278_v28, %v240_v29 }
 0x1fd   :  { %249 = vst [vmem:[#allocation8] sm:$0xff] %v248_v30 }
 0x1fe   :  { %412 = shalt.err (!%p409_p0)
}
 0x1ff   :  { %s413_s17 = scalar_lea.hbm %s541_s6, 128 }
 0x200   :  { %p414_p1 = scmp.ne.s32.totalorder %s541_s6, %s413_s17  ;;  %p417_p2 = scmp.lt.u32.totalorder %s413_s17, %s541_s6 }
 0x202   :  { %p419_p3 = pnand %p417_p2, %p414_p1 }
 0x204   :  { %422 = shalt.err (!%p419_p3)
}
 0x205   :  { %259 = dma.vmem_to_hbm [thread:$0]  %s257_s14, 128, %s541_s6, [#allocation4]  }
 0x206   :  { %427 = dma.done.wait [#allocation4], 128  }
 0x207   :  { %428 = vsyncadd [#allocation4], 4294967168 }
 0x208   :  { %263 = vsyncpa [#allocation3], 1 }
 0x209   :  { %264 = vsyncpa [#allocation6], 1 }
 0x20a   :  { %265 = vsyncpa [#allocation4], 1 }

</bundles_post_ra>
